<compile_context>
chip_gen: v5e
topology: v5e:2x2
jax: 0.10.0
libtpu: 0.0.40
codegen_flags: <defaults>
</compile_context>

<pallas_src>
import jax
import jax.numpy as jnp
from jax import lax
from jax.experimental import pallas as pl
from jax.experimental.pallas import tpu as pltpu

_LANES = 128
_MAX_BLOCK_ROWS = 8192             # (8192, 128) f32 = 4 MiB per input block
_VMEM_LIMIT_BYTES = 32 * 1024 * 1024
_NUM_CORES = 2                     # v7x has 2 TensorCores; harmless on v5e/v6e


def _make_sums_kernel(block_rows, blocks_per_core, num_blocks, rows_in_last,
                      has_ghost):
    """Kernel accumulating per-lane [bce, pred, target, intersection] sums."""

    def accumulate(acc_ref, x, y, valid=None):
        if valid is not None:
            x = jnp.where(valid, x, 0.0)
            y = jnp.where(valid, y, 0.0)
        xy = x * y
        # Numerically stable BCE-with-logits (matches torch BCEWithLogitsLoss):
        #   max(x, 0) - x*y + log(1 + exp(-|x|))
        bce = jnp.maximum(x, 0.0) - xy + jnp.log1p(jnp.exp(-jnp.abs(x)))
        if valid is not None:
            bce = jnp.where(valid, bce, 0.0)
        # Sublane-only reduction per step; the cross-lane reduce happens once
        # in the JAX glue on 2 KiB of data.
        acc_ref[0] += jnp.sum(bce, axis=0, keepdims=True)
        acc_ref[1] += jnp.sum(x, axis=0, keepdims=True)
        acc_ref[2] += jnp.sum(y, axis=0, keepdims=True)
        acc_ref[3] += jnp.sum(xy, axis=0, keepdims=True)

    has_partial = rows_in_last != block_rows

    def kernel(p_ref, t_ref, acc_ref):
        c = pl.program_id(0)           # TensorCore split ("parallel" axis)
        i = pl.program_id(1)           # per-core block index ("arbitrary" axis)
        g = c * blocks_per_core + i    # global block index

        @pl.when(i == 0)
        def _init():
            acc_ref[...] = jnp.zeros_like(acc_ref)

        def full_block():
            accumulate(acc_ref,
                       p_ref[...].astype(jnp.float32),
                       t_ref[...].astype(jnp.float32))

        if not has_partial:
            if has_ghost:
                pl.when(g < num_blocks)(full_block)
            else:
                full_block()                    # hot path: no masking at all
        else:
            # Full blocks (also excludes ghost blocks, whose g >= num_blocks).
            pl.when(g < num_blocks - 1)(full_block)

            @pl.when(g == num_blocks - 1)
            def _partial_block():
                # Row-only mask, applied only on the single partial final block.
                r = lax.broadcasted_iota(jnp.int32, (block_rows, _LANES), 0)
                accumulate(acc_ref,
                           p_ref[...].astype(jnp.float32),
                           t_ref[...].astype(jnp.float32),
                           valid=r < rows_in_last)

    return kernel


def _elementwise_terms(x, y):
    """Plain-JAX [bce_sum, x_sum, y_sum, xy_sum] for tiny tails / tiny inputs."""
    x = x.astype(jnp.float32)
    y = y.astype(jnp.float32)
    xy = x * y
    bce = jnp.maximum(x, 0.0) - xy + jnp.log1p(jnp.exp(-jnp.abs(x)))
    return jnp.sum(bce), jnp.sum(x), jnp.sum(y), jnp.sum(xy)


def dice_loss_tpu(pred, target, *, max_block_rows=_MAX_BLOCK_ROWS):
    """Equivalent of DiceLoss.forward(pred, target): BCE-with-logits + soft dice."""
    assert pred.shape == target.shape
    n = int(pred.size)

    flat_p = pred.reshape(-1)
    flat_t = target.reshape(-1)

    rem = n % _LANES
    n_main = n - rem
    rows = n_main // _LANES

    if rows == 0:
        # Fewer than 128 elements: plain JAX is cheaper than launching a kernel.
        bce_sum, x_sum, y_sum, xy_sum = _elementwise_terms(flat_p, flat_t)
    else:
        # Lane-aligned prefix goes through the kernel (reshape is free for
        # contiguous row-major data).  The <=127-element tail is added in the
        # scalar glue below -- no jnp.pad full-array rewrite, no in-kernel mask.
        if rem:
            main_p = lax.slice(flat_p, (0,), (n_main,))
            main_t = lax.slice(flat_t, (0,), (n_main,))
        else:
            main_p, main_t = flat_p, flat_t
        p2 = main_p.reshape(rows, _LANES)
        t2 = main_t.reshape(rows, _LANES)

        # Biggest block that fits comfortably in scoped VMEM (full-array block
        # for small inputs; equal-to-full-dim blocks need not be 8-aligned).
        block_rows = rows if rows <= max_block_rows else max_block_rows
        num_blocks = pl.cdiv(rows, block_rows)
        rows_in_last = rows - (num_blocks - 1) * block_rows

        # v7x: split the block range across both TensorCores (no-op on 1-TC chips).
        num_cores = _NUM_CORES if num_blocks >= _NUM_CORES else 1
        blocks_per_core = pl.cdiv(num_blocks, num_cores)
        has_ghost = num_cores * blocks_per_core > num_blocks

        kernel = _make_sums_kernel(block_rows, blocks_per_core, num_blocks,
                                   rows_in_last, has_ghost)

        def in_map(c, i):
            g = c * blocks_per_core + i
            if has_ghost:
                # Ghost blocks (past the end) re-read the last valid block; the
                # kernel skips their accumulation entirely.
                g = jnp.minimum(g, num_blocks - 1)
            return (g, 0)

        tile_spec = pl.BlockSpec((block_rows, _LANES), in_map)
        # One private (4, 1, 128) accumulator slab per core, resident across i.
        acc_spec = pl.BlockSpec((4, 1, _LANES), lambda c, i: (c, 0, 0))

        bytes_in = (p2.dtype.itemsize + t2.dtype.itemsize) * rows * _LANES
        cost = pl.CostEstimate(flops=10 * rows * _LANES,
                               transcendentals=2 * rows * _LANES,
                               bytes_accessed=bytes_in + num_cores * 4 * _LANES * 4)

        partial = pl.pallas_call(
            kernel,
            out_shape=jax.ShapeDtypeStruct((num_cores * 4, 1, _LANES), jnp.float32),
            grid=(num_cores, blocks_per_core),
            in_specs=[tile_spec, tile_spec],
            out_specs=acc_spec,
            compiler_params=pltpu.CompilerParams(
                dimension_semantics=("parallel", "arbitrary"),
                vmem_limit_bytes=_VMEM_LIMIT_BYTES),
            cost_estimate=cost,
        )(p2, t2)

        sums = jnp.sum(partial.reshape(num_cores, 4, _LANES), axis=(0, 2))
        bce_sum, x_sum, y_sum, xy_sum = sums[0], sums[1], sums[2], sums[3]

        if rem:
            tail_p = lax.slice(flat_p, (n_main,), (n,))
            tail_t = lax.slice(flat_t, (n_main,), (n,))
            tb, tx, ty, txy = _elementwise_terms(tail_p, tail_t)
            bce_sum = bce_sum + tb
            x_sum = x_sum + tx
            y_sum = y_sum + ty
            xy_sum = xy_sum + txy

    smooth = 1.0
    bce_mean = bce_sum / jnp.float32(n)   # BCEWithLogitsLoss(reduction='mean')
    dice = 1.0 - (2.0 * xy_sum + smooth) / (x_sum + y_sum + smooth)
    return bce_mean + dice


def _reference(pred, target):
    x = pred.reshape(-1).astype(jnp.float32)
    y = target.reshape(-1).astype(jnp.float32)
    bce = jnp.mean(jnp.maximum(x, 0.0) - x * y + jnp.log1p(jnp.exp(-jnp.abs(x))))
    smooth = 1.0
    inter = jnp.sum(x * y)
    dice = 1.0 - (2.0 * inter + smooth) / (jnp.sum(x) + jnp.sum(y) + smooth)
    return bce + dice


if __name__ == "__main__":
    key = jax.random.PRNGKey(0)
    k1, k2, k3, k4 = jax.random.split(key, 4)

    def check(pred, target, **kw):
        loss = jax.block_until_ready(dice_loss_tpu(pred, target, **kw))
        ref = jax.block_until_ready(_reference(pred, target))
        assert jnp.allclose(loss, ref, rtol=1e-5, atol=1e-5), (
            loss, ref, pred.shape, str(pred.dtype))

    # 1) Mask-head-like logits / binary targets, lane-aligned, single block.
    p = jax.random.normal(k1, (2, 4, 16, 16), dtype=jnp.float32)
    t = jax.random.bernoulli(k2, 0.5, (2, 4, 16, 16)).astype(jnp.float32)
    check(p, t)

    # 2) Multi-block + two-core split + partial final block (small block size
    #    here only to exercise the large-input code path at a small shape).
    p = jax.random.normal(k3, (2, 4, 18, 16), dtype=jnp.float32)
    t = jax.random.bernoulli(k4, 0.5, (2, 4, 18, 16)).astype(jnp.float32)
    check(p, t, max_block_rows=8)

    # 3) Non-128-aligned element count -> tail summed in glue, no jnp.pad copy.
    p = jax.random.normal(k1, (2, 3, 13, 13), dtype=jnp.float32)
    t = jax.random.bernoulli(k2, 0.5, (2, 3, 13, 13)).astype(jnp.float32)
    check(p, t)

    # 4) Narrow dtypes pass straight through (kernel upcasts to f32 in VMEM).
    p = jax.random.normal(k3, (2, 4, 16, 16), dtype=jnp.float32).astype(jnp.bfloat16)
    t = jax.random.bernoulli(k4, 0.5, (2, 4, 16, 16)).astype(jnp.bfloat16)
    check(p, t)

    print("KERNEL_OK")
</pallas_src>

<mosaic_0001>
module attributes {stable_mosaic.version = 11 : i64} {
  func.func @kernel(%arg0: i32, %arg1: i32, %arg2: memref<16x128xf32, #tpu.memory_space<vmem>>, %arg3: memref<16x128xf32, #tpu.memory_space<vmem>>, %arg4: memref<4x1x128xf32, #tpu.memory_space<vmem>>) attributes {dimension_semantics = [#tpu.dimension_semantics<parallel>, #tpu.dimension_semantics<arbitrary>], iteration_bounds = array<i64: 1, 1>, scalar_prefetch = 0 : i64, scratch_operands = 0 : i64, tpu.core_type = #tpu.core_type<tc>, window_params = [{transform_indices = @transform_0, window_bounds = array<i64: 16, 128>}, {transform_indices = @transform_1, window_bounds = array<i64: 16, 128>}, {transform_indices = @transform_2, window_bounds = array<i64: 4, 1, 128>}]} {
    %c0_i32 = arith.constant 0 : i32
    %0 = arith.cmpi eq, %arg1, %c0_i32 : i32
    %1 = arith.extui %0 : i1 to i32
    %c0_i32_0 = arith.constant 0 : i32
    %2 = arith.cmpi ne, %1, %c0_i32_0 : i32
    scf.if %2 {
      %cst_30 = arith.constant 0.000000e+00 : f32
      %47 = vector.broadcast %cst_30 : f32 to vector<4x1x128xf32>
      %c0_31 = arith.constant 0 : index
      %c0_32 = arith.constant 0 : index
      %c0_33 = arith.constant 0 : index
      %48 = vector.load %arg4[%c0_31, %c0_32, %c0_33] : memref<4x1x128xf32, #tpu.memory_space<vmem>>, vector<4x1x128xf32>
      tpu.vector_store %arg4[%c0_31, %c0_32, %c0_33], %47 {strides = array<i32>} : memref<4x1x128xf32, #tpu.memory_space<vmem>>, vector<4x1x128xf32>,
    } else {
    }
    %c0 = arith.constant 0 : index
    %c0_1 = arith.constant 0 : index
    %3 = vector.load %arg2[%c0, %c0_1] : memref<16x128xf32, #tpu.memory_space<vmem>>, vector<16x128xf32>
    %c0_2 = arith.constant 0 : index
    %c0_3 = arith.constant 0 : index
    %4 = vector.load %arg3[%c0_2, %c0_3] : memref<16x128xf32, #tpu.memory_space<vmem>>, vector<16x128xf32>
    %5 = arith.mulf %3, %4 : vector<16x128xf32>
    %cst = arith.constant 0.000000e+00 : f32
    %6 = vector.broadcast %cst : f32 to vector<16x128xf32>
    %7 = arith.maximumf %3, %6 : vector<16x128xf32>
    %8 = arith.subf %7, %5 : vector<16x128xf32>
    %9 = math.absf %3 : vector<16x128xf32>
    %cst_4 = arith.constant 0.000000e+00 : f32
    %10 = vector.broadcast %cst_4 : f32 to vector<16x128xf32>
    %11 = arith.subf %10, %9 : vector<16x128xf32>
    %12 = math.exp %11 : vector<16x128xf32>
    %13 = math.log1p %12 : vector<16x128xf32>
    %14 = arith.addf %8, %13 : vector<16x128xf32>
    %c0_5 = arith.constant 0 : index
    %c0_6 = arith.constant 0 : index
    %c0_7 = arith.constant 0 : index
    %15 = vector.load %arg4[%c0_5, %c0_6, %c0_7] : memref<4x1x128xf32, #tpu.memory_space<vmem>>, vector<1x1x128xf32>
    %16 = vector.shape_cast %15 : vector<1x1x128xf32> to vector<1x128xf32>
    %cst_8 = arith.constant dense<0.000000e+00> : vector<128xf32>
    %17 = vector.multi_reduction <add>, %14, %cst_8 [0] : vector<16x128xf32> to vector<128xf32>
    %18 = vector.shape_cast %17 : vector<128xf32> to vector<1x128xf32>
    %19 = arith.addf %16, %18 : vector<1x128xf32>
    %c0_9 = arith.constant 0 : index
    %c0_10 = arith.constant 0 : index
    %c0_11 = arith.constant 0 : index
    %20 = vector.load %arg4[%c0_9, %c0_10, %c0_11] : memref<4x1x128xf32, #tpu.memory_space<vmem>>, vector<1x1x128xf32>
    %21 = vector.shape_cast %20 : vector<1x1x128xf32> to vector<1x128xf32>
    %22 = vector.shape_cast %19 : vector<1x128xf32> to vector<1x1x128xf32>
    tpu.vector_store %arg4[%c0_9, %c0_10, %c0_11], %22 {strides = array<i32>} : memref<4x1x128xf32, #tpu.memory_space<vmem>>, vector<1x1x128xf32>,
    %c1 = arith.constant 1 : index
    %c0_12 = arith.constant 0 : index
    %c0_13 = arith.constant 0 : index
    %23 = vector.load %arg4[%c1, %c0_12, %c0_13] : memref<4x1x128xf32, #tpu.memory_space<vmem>>, vector<1x1x128xf32>
    %24 = vector.shape_cast %23 : vector<1x1x128xf32> to vector<1x128xf32>
    %cst_14 = arith.constant dense<0.000000e+00> : vector<128xf32>
    %25 = vector.multi_reduction <add>, %3, %cst_14 [0] : vector<16x128xf32> to vector<128xf32>
    %26 = vector.shape_cast %25 : vector<128xf32> to vector<1x128xf32>
    %27 = arith.addf %24, %26 : vector<1x128xf32>
    %c1_15 = arith.constant 1 : index
    %c0_16 = arith.constant 0 : index
    %c0_17 = arith.constant 0 : index
    %28 = vector.load %arg4[%c1_15, %c0_16, %c0_17] : memref<4x1x128xf32, #tpu.memory_space<vmem>>, vector<1x1x128xf32>
    %29 = vector.shape_cast %28 : vector<1x1x128xf32> to vector<1x128xf32>
    %30 = vector.shape_cast %27 : vector<1x128xf32> to vector<1x1x128xf32>
    tpu.vector_store %arg4[%c1_15, %c0_16, %c0_17], %30 {strides = array<i32>} : memref<4x1x128xf32, #tpu.memory_space<vmem>>, vector<1x1x128xf32>,
    %c2 = arith.constant 2 : index
    %c0_18 = arith.constant 0 : index
    %c0_19 = arith.constant 0 : index
    %31 = vector.load %arg4[%c2, %c0_18, %c0_19] : memref<4x1x128xf32, #tpu.memory_space<vmem>>, vector<1x1x128xf32>
    %32 = vector.shape_cast %31 : vector<1x1x128xf32> to vector<1x128xf32>
    %cst_20 = arith.constant dense<0.000000e+00> : vector<128xf32>
    %33 = vector.multi_reduction <add>, %4, %cst_20 [0] : vector<16x128xf32> to vector<128xf32>
    %34 = vector.shape_cast %33 : vector<128xf32> to vector<1x128xf32>
    %35 = arith.addf %32, %34 : vector<1x128xf32>
    %c2_21 = arith.constant 2 : index
    %c0_22 = arith.constant 0 : index
    %c0_23 = arith.constant 0 : index
    %36 = vector.load %arg4[%c2_21, %c0_22, %c0_23] : memref<4x1x128xf32, #tpu.memory_space<vmem>>, vector<1x1x128xf32>
    %37 = vector.shape_cast %36 : vector<1x1x128xf32> to vector<1x128xf32>
    %38 = vector.shape_cast %35 : vector<1x128xf32> to vector<1x1x128xf32>
    tpu.vector_store %arg4[%c2_21, %c0_22, %c0_23], %38 {strides = array<i32>} : memref<4x1x128xf32, #tpu.memory_space<vmem>>, vector<1x1x128xf32>,
    %c3 = arith.constant 3 : index
    %c0_24 = arith.constant 0 : index
    %c0_25 = arith.constant 0 : index
    %39 = vector.load %arg4[%c3, %c0_24, %c0_25] : memref<4x1x128xf32, #tpu.memory_space<vmem>>, vector<1x1x128xf32>
    %40 = vector.shape_cast %39 : vector<1x1x128xf32> to vector<1x128xf32>
    %cst_26 = arith.constant dense<0.000000e+00> : vector<128xf32>
    %41 = vector.multi_reduction <add>, %5, %cst_26 [0] : vector<16x128xf32> to vector<128xf32>
    %42 = vector.shape_cast %41 : vector<128xf32> to vector<1x128xf32>
    %43 = arith.addf %40, %42 : vector<1x128xf32>
    %c3_27 = arith.constant 3 : index
    %c0_28 = arith.constant 0 : index
    %c0_29 = arith.constant 0 : index
    %44 = vector.load %arg4[%c3_27, %c0_28, %c0_29] : memref<4x1x128xf32, #tpu.memory_space<vmem>>, vector<1x1x128xf32>
    %45 = vector.shape_cast %44 : vector<1x1x128xf32> to vector<1x128xf32>
    %46 = vector.shape_cast %43 : vector<1x128xf32> to vector<1x1x128xf32>
    tpu.vector_store %arg4[%c3_27, %c0_28, %c0_29], %46 {strides = array<i32>} : memref<4x1x128xf32, #tpu.memory_space<vmem>>, vector<1x1x128xf32>,
    return
  }
  func.func @transform_0(%arg0: i32, %arg1: i32) -> (i32, i32) {
    %c1_i32 = arith.constant 1 : i32
    %0 = arith.muli %arg0, %c1_i32 : i32
    %1 = arith.addi %0, %arg1 : i32
    %c0_i32 = arith.constant 0 : i32
    %c0_i32_0 = arith.constant 0 : i32
    return %1, %c0_i32 : i32, i32
  }
  func.func @transform_1(%arg0: i32, %arg1: i32) -> (i32, i32) {
    %c1_i32 = arith.constant 1 : i32
    %0 = arith.muli %arg0, %c1_i32 : i32
    %1 = arith.addi %0, %arg1 : i32
    %c0_i32 = arith.constant 0 : i32
    %c0_i32_0 = arith.constant 0 : i32
    return %1, %c0_i32 : i32, i32
  }
  func.func @transform_2(%arg0: i32, %arg1: i32) -> (i32, i32, i32) {
    %c0_i32 = arith.constant 0 : i32
    %c0_i32_0 = arith.constant 0 : i32
    %c0_i32_1 = arith.constant 0 : i32
    return %arg0, %c0_i32, %c0_i32_0 : i32, i32, i32
  }
}

</mosaic_0001>

<bundles_post_ra>
// kernel: tpu_custom_call.1
= control target key start
LH: loop header
LB: loop body
LE: loop exit
PB: predicated region body
PF: predicated region fallthrough
CT: control target
= control target key end

     0   :  { %7 = vsyncpa [#allocation3], 0  ;;  %s297_s0 = inlined_call_operand.hbm [shape: f32[16,128], index: 0, kind: input, shape index: {}]   ;;  %s298_s1 = inlined_call_operand.hbm [shape: f32[16,128], index: 1, kind: input, shape index: {}]   ;;  %s299_s2 = inlined_call_operand.hbm [shape: f32[4,1,128], index: 2, kind: output, shape index: {}]  }
   0x1   :  { %8 = vsyncpa [#allocation6], 0 }
   0x2   :  { %9 = vsyncpa [#allocation4], 0  ;;  %s18_s11 = sshll.u32 %s297_s0, 4  ;;  %s259_s12 = smov [#allocation2]   ;;  %s19_s11 = int_to_ptr.hbm [resolvable:$true] %s18_s11 }
   0x3   :  { %s20_s13 = sshll.u32 %s259_s12, 4  ;;  %s35_s16 = sshll.u32 %s298_s1, 4  ;;  %s21_s13 = int_to_ptr.vmem [resolvable:$true] %s20_s13  ;;  %s36_s16 = int_to_ptr.hbm [resolvable:$true] %s35_s16 }
   0x4   :  { %s260_s17 = smov 128   ;;  %s261_s18 = smov 8  }
   0x5   :  { %26 = dma.hbm_to_vmem [thread:$0]  %s19_s11, 256, %s21_s13, [#allocation3], %s260_s17, %s260_s17, %s261_s18  }
   0x6   :  { %s262_s19 = smov [#allocation5]  }
   0x7   :  { %s37_s20 = sshll.u32 %s262_s19, 4  ;;  %s38_s20 = int_to_ptr.vmem [resolvable:$true] %s37_s20 }
   0x8   :  { %43 = dma.hbm_to_vmem [thread:$0]  %s36_s16, 256, %s38_s20, [#allocation6], %s260_s17, %s260_s17, %s261_s18  }
   0x9   :  { %253 = dma.done.wait [#allocation3], 256  }
   0xa   :  { %254 = vsyncadd [#allocation3], 4294967040 }
   0xb   :  { %255 = dma.done.wait [#allocation6], 256  }
   0xc   :  { %256 = vsyncadd [#allocation6], 4294967040  ;;  %v263_v0 = vmov 0.0   ;;  %v64_v1 = vld [vmem:[#allocation2] sm:$0xff]  ;;  %v288_v2 = vld [vmem:[#allocation2 + $0x8] sm:$0xff]  ;;  %s264_s0 = smov [#allocation7]  }
   0xd   :  { %60 = vst [vmem:[#allocation7] sm:$0x1] %v263_v0  ;;  %v66_v3 = vld [vmem:[#allocation5] sm:$0xff]  ;;  %v67_v4 = vld [vmem:[#allocation5 + $0x8] sm:$0xff]  ;;  %v74_v5 = vand.u32 2147483647, %v64_v1  ;;  %v114_v7 = vadd.f32 %v288_v2, %v64_v1 }
   0xe   :  { %61 = vst [vmem:[#allocation7 + $0x1] sm:$0x1] %v263_v0  ;;  %v75_v6 = vand.u32 2147483647, %v288_v2  ;;  %v125_v8 = vadd.f32 %v67_v4, %v66_v3  ;;  %v68_v9 = vmul.f32 %v66_v3, %v64_v1  ;;  %v69_v10 = vmul.f32 %v67_v4, %v288_v2  ;;  %s149_s1 = sshll.u32 %s264_s0, 4  ;;  %s151_s23 = sshll.u32 %s299_s2, 4  ;;  %s150_s1 = int_to_ptr.vmem [resolvable:$true] %s149_s1  ;;  %s152_s23 = int_to_ptr.hbm [resolvable:$true] %s151_s23 }
   0xf   :  { %62 = vst [vmem:[#allocation7 + $0x2] sm:$0x1] %v263_v0  ;;  %v76_v11 = vsub.f32 0.0, %v74_v5  ;;  %v115_v13 = vrot.slane %v114_v7, 4  ;;  %v70_v40 = vmax.f32 %v64_v1, 0.0  ;;  %v71_v42 = vmax.f32 %v288_v2, 0.0 }
  0x10   :  { %63 = vst [vmem:[#allocation7 + $0x3] sm:$0x1] %v263_v0  ;;  %v77_v12 = vsub.f32 0.0, %v75_v6  ;;  %v126_v14 = vrot.slane %v125_v8, 4  ;;  %v136_v16 = vadd.f32 %v69_v10, %v68_v9  ;;  %s265_s24 = smov 16   ;;  %s266_s25 = smov 1  }
  0x11   :  { %v78_v15 = vmul.f32 1.442695, %v76_v11  ;;  %v116_v18 = vadd.f32 %v115_v13, %v114_v7  ;;  %v72_v53 = vsub.f32 %v70_v40, %v68_v9  ;;  %v73_v57 = vsub.f32 %v71_v42, %v69_v10 }
  0x12   :  { %v80_v17 = vmul.f32 1.442695, %v77_v12  ;;  %v127_v19 = vadd.f32 %v126_v14, %v125_v8  ;;  %v137_v20 = vrot.slane %v136_v16, 4 }
  0x13   :  { %173 = vpow2.f32 %v78_v15  ;;  %v117_v21 = vrot.slane %v116_v18, 2 }
  0x14   :  { %175 = vpow2.f32 %v80_v17  ;;  %v128_v22 = vrot.slane %v127_v19, 2  ;;  %v138_v23 = vadd.f32 %v137_v20, %v136_v16  ;;  %v102_v6 = vld [vmem:[#allocation7] sm:$0x1] }
  0x15   :  { %v118_v24 = vadd.f32 %v117_v21, %v116_v18  ;;  %v113_v30 = vld [vmem:[#allocation7 + $0x1] sm:$0x1] }
  0x16   :  { %v129_v25 = vadd.f32 %v128_v22, %v127_v19  ;;  %v139_v26 = vrot.slane %v138_v23, 2  ;;  %v124_v35 = vld [vmem:[#allocation7 + $0x2] sm:$0x1] }
  0x17   :  { %v119_v27 = vrot.slane %v118_v24, 1  ;;  %v135_v49 = vld [vmem:[#allocation7 + $0x3] sm:$0x1] }
  0x18   :  { %v130_v28 = vrot.slane %v129_v25, 1  ;;  %v140_v36 = vadd.f32 %v139_v26, %v138_v23 }
  0x19   :  { %v174_v29 = vpop.eup %173  ;;  %v120_v34 = vadd.f32 %v119_v27, %v118_v24 }
  0x1a   :  { %v176_v31 = vpop.eup %175  ;;  %v82_v32 = vadd.f32 1.0, %v174_v29  ;;  %v85_v33 = vmul.f32 -0.5, %v174_v29  ;;  %v131_v39 = vadd.f32 %v130_v28, %v129_v25  ;;  %v88_v45 = vand.u32 2147483647, %v174_v29 }
  0x1b   :  { %v91_v37 = vadd.f32 1.0, %v176_v31  ;;  %v94_v38 = vmul.f32 -0.5, %v176_v31  ;;  %v121_v41 = vadd.f32 %v120_v34, %v113_v30  ;;  %v141_v47 = vrot.slane %v140_v36, 1 }
  0x1c   :  { %177 = vlog2.f32 %v82_v32  ;;  %v86_v43 = vadd.f32 1.0, %v85_v33  ;;  %v132_v44 = vadd.f32 %v131_v39, %v124_v35  ;;  %v97_v48 = vand.u32 2147483647, %v176_v31 }
  0x1d   :  { %179 = vlog2.f32 %v91_v37  ;;  %v95_v46 = vadd.f32 1.0, %v94_v38  ;;  %122 = vst [vmem:[#allocation7 + $0x1] sm:$0x1] %v121_v41  ;;  %v142_v50 = vadd.f32 %v141_v47, %v140_v36  ;;  %vm89_vm0 = vcmp.lt.f32.partialorder %v88_v45, 0.0004427343 }
  0x1e   :  { %133 = vst [vmem:[#allocation7 + $0x2] sm:$0x1] %v132_v44  ;;  %v87_v51 = vmul.f32 %v174_v29, %v86_v43  ;;  %vm98_vm1 = vcmp.lt.f32.partialorder %v97_v48, 0.0004427343 }
  0x1f   :  { %v96_v54 = vmul.f32 %v176_v31, %v95_v46  ;;  %v143_v55 = vadd.f32 %v142_v50, %v135_v49 }
  0x21   :  { %144 = vst [vmem:[#allocation7 + $0x3] sm:$0x1] %v143_v55 }
  0x22   :  { %v178_v52 = vpop.eup %177 }
  0x23   :  { %v180_v56 = vpop.eup %179  ;;  %v84_v58 = vmul.f32 0.6931472, %v178_v52 }
  0x24   :  { %v93_v59 = vmul.f32 0.6931472, %v180_v56 }
  0x25   :  { %v90_v60 = vsel %vm89_vm0, %v87_v51, %v84_v58 }
  0x26   :  { %v99_v61 = vsel %vm98_vm1, %v96_v54, %v93_v59  ;;  %v100_v62 = vadd.f32 %v90_v60, %v72_v53 }
  0x27   :  { %v101_v63 = vadd.f32 %v99_v61, %v73_v57 }
  0x29   :  { %v103_v0 = vadd.f32 %v101_v63, %v100_v62 }
  0x2b   :  { %v104_v1 = vrot.slane %v103_v0, 4 }
  0x2d   :  { %v105_v2 = vadd.f32 %v104_v1, %v103_v0 }
  0x2f   :  { %v106_v3 = vrot.slane %v105_v2, 2 }
  0x31   :  { %v107_v4 = vadd.f32 %v106_v3, %v105_v2 }
  0x33   :  { %v108_v5 = vrot.slane %v107_v4, 1 }
  0x35   :  { %v109_v7 = vadd.f32 %v108_v5, %v107_v4 }
  0x37   :  { %v110_v8 = vadd.f32 %v109_v7, %v102_v6 }
  0x39   :  { %111 = vst [vmem:[#allocation7] sm:$0x1] %v110_v8 }
  0x3a   :  { %157 = dma.vmem_to_hbm [thread:$0]  %s150_s1, 64, %s152_s23, [#allocation4], %s265_s24, %s265_s24, %s266_s25  }
  0x3b   :  { %257 = dma.done.wait [#allocation4], 64  }
  0x3c   :  { %258 = vsyncadd [#allocation4], 4294967232 }
  0x3d   :  { %162 = vsyncpa [#allocation3], 1 }
  0x3e   :  { %163 = vsyncpa [#allocation6], 1 }
  0x3f   :  { %164 = vsyncpa [#allocation4], 1 }

</bundles_post_ra>
